<compile_context>
chip_gen: v7x
topology: tpu7x:2x2x1
jax: 0.10.0
libtpu: 0.0.40
codegen_flags: <defaults>
</compile_context>

<pallas_src>
import functools

import jax
import jax.numpy as jnp
from jax import lax
from jax.experimental import pallas as pl
from jax.experimental.pallas import tpu as pltpu


def _head_kernel(x_ref, w_ref, o_ref, *, head_size, compute_dtype):
    # x_ref: (Bblk, T, C)   one block of batch elements (native activation dtype)
    # w_ref: (C, 3H)        fused [Wq * C**-0.5 | Wk | Wv], already compute_dtype
    # o_ref: (Bblk, T, H)
    Bblk, T, C = x_ref.shape
    H = head_size

    x = x_ref[...].astype(compute_dtype)            # (Bblk, T, C)
    w = w_ref[...].astype(compute_dtype)            # (C, 3H) (no-op cast)

    # Single fused projection matmul; M = Bblk*T fills MXU rows better than T.
    xm = x.reshape(Bblk * T, C)
    qkv = jnp.dot(xm, w, preferred_element_type=jnp.float32)   # (Bblk*T, 3H) f32
    qkv = qkv.reshape(Bblk, T, 3 * H)
    # NOTE: lane slices at multiples of H are not 128-aligned for H < 128; the
    # relayout is modest for a single head and disappears with multi-head
    # fusion (see TODO at top of file).
    q = qkv[:, :, 0 * H:1 * H].astype(compute_dtype)   # 1/sqrt(C) already folded in
    k = qkv[:, :, 1 * H:2 * H].astype(compute_dtype)
    v = qkv[:, :, 2 * H:3 * H].astype(compute_dtype)

    # Q @ K^T as a batched contraction over the last dims (no XLU transpose).
    s = jnp.einsum('bqd,bkd->bqk', q, k,
                   preferred_element_type=jnp.float32)          # (Bblk, T, T) f32

    # Causal (lower-triangular) mask.  Every row keeps its diagonal entry, so
    # -inf is NaN-safe here; revisit if q/kv tiling introduces fully-masked rows.
    row = lax.broadcasted_iota(jnp.int32, (T, T), 0)
    col = lax.broadcasted_iota(jnp.int32, (T, T), 1)
    s = jnp.where((col <= row)[None, :, :], s, -jnp.inf)

    # Numerically stable softmax along the last dim, all in f32.
    m = jnp.max(s, axis=-1, keepdims=True)
    e = jnp.exp(s - m)
    denom = jnp.sum(e, axis=-1, keepdims=True)
    # Approx reciprocal (EUP vrcp, free slot) on the bf16 fast path; exact on f32.
    use_approx = jnp.dtype(compute_dtype) != jnp.dtype(jnp.float32)
    p = e * pl.reciprocal(denom, approx=bool(use_approx))

    # dropout: eval-mode identity (see TODO).

    out = jnp.einsum('bqk,bkd->bqd', p.astype(compute_dtype), v,
                     preferred_element_type=jnp.float32)        # (Bblk, T, H) f32
    o_ref[...] = out.astype(o_ref.dtype)


def _choose_batch_block(B, T, C, H, x_bytes, out_bytes, cdt_bytes,
                        target_m=512, vmem_budget=12 * 1024 * 1024):
    """Largest divisor of B with M = Bblk*T <= target_m and an estimated live
    VMEM footprint under `vmem_budget` (conservative: fits v5e's 16 MiB default
    scoped VMEM, leaves headroom on v7x's 64 MiB).  Keeps the grid length >= 2
    whenever B >= 2 so the 'parallel' batch axis can shard across megacore /
    v7x's two TensorCores."""
    divisors = [d for d in range(1, B + 1) if B % d == 0]

    def vmem_bytes(d):
        mrows = d * T
        io = 2 * mrows * C * x_bytes + 2 * mrows * H * out_bytes   # dbl-buffered x / out
        wgt = 2 * C * 3 * H * cdt_bytes                            # dbl-buffered weight
        tmp = (mrows * C * cdt_bytes        # casted x
               + mrows * 3 * H * 4          # qkv f32
               + 3 * mrows * T * 4          # s / e / p f32
               + mrows * H * 4)             # f32 accumulator before store
        return io + wgt + tmp

    best = 1
    for d in divisors:
        if d * T <= max(target_m, T) and vmem_bytes(d) <= vmem_budget:
            best = d
    if B >= 2:
        while best > 1 and B // best < 2:
            best = max(d for d in divisors if d < best)
    return best


def head_forward(x, wk, wq, wv, *, batch_block=None, compute_dtype=jnp.bfloat16):
    """Single-head causal self-attention (eval-mode dropout).

    x: (B, T, C) in its native activation dtype (f32 or bf16; no wrapper cast).
    wk/wq/wv: PyTorch nn.Linear weights, shape (H, C) = (head_size, n_embd).
    """
    B, T, C = x.shape
    H = wk.shape[0]

    # Fuse the three projections into one (C, 3H) weight, fold the 1/sqrt(C)
    # attention scale into the Q columns, and cast to the MXU input dtype
    # (NOT x.dtype — keeps the f32 path on true f32 weights).
    scale = jnp.float32(C) ** jnp.float32(-0.5)
    w_qkv = jnp.concatenate(
        [wq.T.astype(jnp.float32) * scale,
         wk.T.astype(jnp.float32),
         wv.T.astype(jnp.float32)],
        axis=1).astype(compute_dtype)

    if batch_block is None:
        batch_block = _choose_batch_block(
            B, T, C, H,
            x_bytes=x.dtype.itemsize,
            out_bytes=x.dtype.itemsize,
            cdt_bytes=jnp.dtype(compute_dtype).itemsize)
    assert B % batch_block == 0, "batch_block must divide B"

    grid = (B // batch_block,)
    kernel = functools.partial(_head_kernel, head_size=H,
                               compute_dtype=compute_dtype)

    return pl.pallas_call(
        kernel,
        out_shape=jax.ShapeDtypeStruct((B, T, H), x.dtype),
        grid_spec=pltpu.PrefetchScalarGridSpec(
            num_scalar_prefetch=0,
            grid=grid,
            in_specs=[
                pl.BlockSpec((batch_block, T, C), lambda b: (b, 0, 0)),
                pl.BlockSpec((C, 3 * H), lambda b: (0, 0)),
            ],
            out_specs=pl.BlockSpec((batch_block, T, H), lambda b: (b, 0, 0)),
        ),
        compiler_params=pltpu.CompilerParams(
            dimension_semantics=("parallel",),
        ),
    )(x, w_qkv)


def head_reference(x, wk, wq, wv):
    """Pure-JAX reference mirroring the PyTorch forward (eval mode)."""
    B, T, C = x.shape
    k = x @ wk.T
    q = x @ wq.T
    v = x @ wv.T
    wei = (q @ jnp.swapaxes(k, -2, -1)) * (C ** -0.5)
    mask = jnp.tril(jnp.ones((T, T), dtype=bool))
    wei = jnp.where(mask, wei, -jnp.inf)
    wei = jax.nn.softmax(wei, axis=-1)
    return wei @ v


if __name__ == "__main__":
    # Small shapes consistent with the module's forward: B, T, C and head_size.
    B, T, C, H = 2, 8, 32, 16

    key = jax.random.PRNGKey(0)
    kx, kk, kq, kv = jax.random.split(key, 4)

    x = jax.random.normal(kx, (B, T, C), dtype=jnp.float32)
    # nn.Linear weight shape is (out_features, in_features) = (H, C)
    wk = jax.random.normal(kk, (H, C), dtype=jnp.float32) * (C ** -0.5)
    wq = jax.random.normal(kq, (H, C), dtype=jnp.float32) * (C ** -0.5)
    wv = jax.random.normal(kv, (H, C), dtype=jnp.float32) * (C ** -0.5)

    ref = head_reference(x, wk, wq, wv)

    # Default fast path: bf16 MXU inputs, f32 accumulation + f32 softmax.
    out = jax.block_until_ready(head_forward(x, wk, wq, wv))
    assert out.shape == (B, T, H)
    assert jnp.allclose(out, ref, atol=3e-2, rtol=3e-2), "bf16 kernel mismatch vs reference"

    # f32 MXU path: tight tolerance against the f32 reference.
    out_f32 = jax.block_until_ready(
        head_forward(x, wk, wq, wv, compute_dtype=jnp.float32))
    assert jnp.allclose(out_f32, ref, atol=1e-4, rtol=1e-4), "f32 kernel mismatch vs reference"

    print("KERNEL_OK")
</pallas_src>

<mosaic_0001>
module attributes {stable_mosaic.version = 11 : i64} {
  func.func @_head_kernel(%arg0: i32, %arg1: memref<1x8x32xf32, #tpu.memory_space<vmem>>, %arg2: memref<32x48xbf16, #tpu.memory_space<vmem>>, %arg3: memref<1x8x16xf32, #tpu.memory_space<vmem>>) attributes {dimension_semantics = [#tpu.dimension_semantics<parallel>], iteration_bounds = array<i64: 2>, scalar_prefetch = 0 : i64, scratch_operands = 0 : i64, tpu.core_type = #tpu.core_type<tc>, window_params = [{transform_indices = @transform_0, window_bounds = array<i64: 1, 8, 32>}, {pipeline_mode = #tpu.pipeline_mode<synchronous>, transform_indices = @transform_1, window_bounds = array<i64: 32, 48>}, {transform_indices = @transform_2, window_bounds = array<i64: 1, 8, 16>}]} {
    %c0 = arith.constant 0 : index
    %c0_0 = arith.constant 0 : index
    %c0_1 = arith.constant 0 : index
    %0 = vector.load %arg1[%c0, %c0_0, %c0_1] : memref<1x8x32xf32, #tpu.memory_space<vmem>>, vector<1x8x32xf32>
    %1 = arith.truncf %0 : vector<1x8x32xf32> to vector<1x8x32xbf16>
    %c0_2 = arith.constant 0 : index
    %c0_3 = arith.constant 0 : index
    %2 = vector.load %arg2[%c0_2, %c0_3] : memref<32x48xbf16, #tpu.memory_space<vmem>>, vector<32x48xbf16>
    %3 = vector.shape_cast %1 : vector<1x8x32xbf16> to vector<8x32xbf16>
    %cst = arith.constant dense<0.000000e+00> : vector<8x48xf32>
    %4 = tpu.matmul %3, %2, %cst {dimension_numbers = #tpu.dot_dimension_numbers<[1], [0], [0], [1], [0, 0, 1, 1], [], []>} : vector<8x32xbf16>, vector<32x48xbf16>, vector<8x48xf32> -> vector<8x48xf32>
    %5 = vector.shape_cast %4 : vector<8x48xf32> to vector<1x8x48xf32>
    %6 = vector.extract_strided_slice %5 {offsets = [0, 0, 0], sizes = [1, 8, 16], strides = [1, 1, 1]} : vector<1x8x48xf32> to vector<1x8x16xf32>
    %7 = arith.truncf %6 : vector<1x8x16xf32> to vector<1x8x16xbf16>
    %8 = vector.extract_strided_slice %5 {offsets = [0, 0, 16], sizes = [1, 8, 16], strides = [1, 1, 1]} : vector<1x8x48xf32> to vector<1x8x16xf32>
    %9 = arith.truncf %8 : vector<1x8x16xf32> to vector<1x8x16xbf16>
    %10 = vector.extract_strided_slice %5 {offsets = [0, 0, 32], sizes = [1, 8, 16], strides = [1, 1, 1]} : vector<1x8x48xf32> to vector<1x8x16xf32>
    %11 = arith.truncf %10 : vector<1x8x16xf32> to vector<1x8x16xbf16>
    "tpu.trace_start"() <{level = 10 : i32, message = "bqd,bkd->bqk"}> : () -> ()
    %cst_4 = arith.constant dense<0.000000e+00> : vector<1x8x8xf32>
    %12 = tpu.matmul %7, %9, %cst_4 {dimension_numbers = #tpu.dot_dimension_numbers<[2], [2], [1], [1], [0, 0, 0, 1, 1, 1], [0], [0]>} : vector<1x8x16xbf16>, vector<1x8x16xbf16>, vector<1x8x8xf32> -> vector<1x8x8xf32>
    "tpu.trace_stop"() : () -> ()
    %13 = tpu.iota {dimensions = array<i32: 0>} : vector<8x8xi32>
    %14 = tpu.iota {dimensions = array<i32: 1>} : vector<8x8xi32>
    %15 = arith.cmpi sle, %14, %13 : vector<8x8xi32>
    %16 = vector.shape_cast %15 : vector<8x8xi1> to vector<1x8x8xi1>
    %cst_5 = arith.constant 0xFF800000 : f32
    %17 = vector.broadcast %cst_5 : f32 to vector<1x8x8xf32>
    %18 = arith.select %16, %12, %17 : vector<1x8x8xi1>, vector<1x8x8xf32>
    %cst_6 = arith.constant dense<0xFF800000> : vector<1x8xf32>
    %19 = vector.multi_reduction <maximumf>, %18, %cst_6 [2] : vector<1x8x8xf32> to vector<1x8xf32>
    %20 = vector.shape_cast %19 : vector<1x8xf32> to vector<1x8x1xf32>
    %21 = vector.broadcast %20 : vector<1x8x1xf32> to vector<1x8x8xf32>
    %22 = arith.subf %18, %21 : vector<1x8x8xf32>
    %23 = math.exp %22 : vector<1x8x8xf32>
    %cst_7 = arith.constant dense<0.000000e+00> : vector<1x8xf32>
    %24 = vector.multi_reduction <add>, %23, %cst_7 [2] : vector<1x8x8xf32> to vector<1x8xf32>
    %25 = vector.shape_cast %24 : vector<1x8xf32> to vector<1x8x1xf32>
    %26 = tpu.reciprocal %25 {approx = true} : vector<1x8x1xf32> -> vector<1x8x1xf32>
    %27 = vector.broadcast %26 : vector<1x8x1xf32> to vector<1x8x8xf32>
    %28 = arith.mulf %23, %27 : vector<1x8x8xf32>
    %29 = arith.truncf %28 : vector<1x8x8xf32> to vector<1x8x8xbf16>
    "tpu.trace_start"() <{level = 10 : i32, message = "bqk,bkd->bqd"}> : () -> ()
    %cst_8 = arith.constant dense<0.000000e+00> : vector<1x8x16xf32>
    %30 = tpu.matmul %29, %11, %cst_8 {dimension_numbers = #tpu.dot_dimension_numbers<[2], [1], [1], [2], [0, 0, 0, 1, 1, 2], [0], [0]>} : vector<1x8x8xbf16>, vector<1x8x16xbf16>, vector<1x8x16xf32> -> vector<1x8x16xf32>
    "tpu.trace_stop"() : () -> ()
    %c0_9 = arith.constant 0 : index
    %c0_10 = arith.constant 0 : index
    %c0_11 = arith.constant 0 : index
    %31 = vector.load %arg3[%c0_9, %c0_10, %c0_11] : memref<1x8x16xf32, #tpu.memory_space<vmem>>, vector<1x8x16xf32>
    tpu.vector_store %arg3[%c0_9, %c0_10, %c0_11], %30 {strides = array<i32>} : memref<1x8x16xf32, #tpu.memory_space<vmem>>, vector<1x8x16xf32>,
    return
  }
  func.func @transform_0(%arg0: i32) -> (i32, i32, i32) {
    %c0_i32 = arith.constant 0 : i32
    %c0_i32_0 = arith.constant 0 : i32
    %c0_i32_1 = arith.constant 0 : i32
    return %arg0, %c0_i32, %c0_i32_0 : i32, i32, i32
  }
  func.func @transform_1(%arg0: i32) -> (i32, i32) {
    %c0_i32 = arith.constant 0 : i32
    %c0_i32_0 = arith.constant 0 : i32
    %c0_i32_1 = arith.constant 0 : i32
    return %c0_i32, %c0_i32_0 : i32, i32
  }
  func.func @transform_2(%arg0: i32) -> (i32, i32, i32) {
    %c0_i32 = arith.constant 0 : i32
    %c0_i32_0 = arith.constant 0 : i32
    %c0_i32_1 = arith.constant 0 : i32
    return %arg0, %c0_i32, %c0_i32_0 : i32, i32, i32
  }
}

</mosaic_0001>

<bundles_post_ra>
// kernel: tpu_custom_call.1
= control target key start
LH: loop header
LB: loop body
LE: loop exit
PB: predicated region body
PF: predicated region fallthrough
CT: control target
= control target key end

     0   :  { %7 = vsyncpa [#allocation3], 0  ;;  %s926_s0 = inlined_call_operand.hbm [shape: f32[2,8,32], index: 0, kind: input, shape index: {}]   ;;  %s927_s1 = inlined_call_operand.hbm [shape: bf16[32,48], index: 1, kind: input, shape index: {}]   ;;  %s928_s2 = inlined_call_operand.hbm [shape: f32[2,8,16], index: 2, kind: output, shape index: {}]  }
   0x1   :  { %9 = vsyncpa [#allocation3 + $0x1], 0 }
   0x2   :  { %10 = vsyncpa [#allocation6], 0 }
   0x3   :  { %11 = vsyncpa [#allocation4], 0 }
   0x4   :  { %13 = vsyncpa [#allocation4 + $0x1], 0  ;;  %s720_s9 = smov 0   ;;  %s722_s10 = smov 0  }
   0x5   :  { %s724_s11 = smov 0   ;;  %s726_s12 = smov 0  }
   0x6 LB: > { %s741_s13 = sadd.s32 4294967295, %s694_s12   ;;  %s451_s14 = sadd.s32 4294967294, %s694_s12   ;;  %s694_s12 = sphi %s726_s12, %s948_s12   ;;  %s690_s11 = sphi %s724_s11, %s947_s11   ;;  %s686_s10 = sphi %s722_s10, %s946_s10   ;;  %s682_s9 = sphi %s720_s9, %s945_s9  }
   0x7   : > { %p39_p0 = scmp.ne.s32.totalorder %s686_s10, %s682_s9  ;;  %p929_p1 = scmp.eq.s32.totalorder %s741_s13, 0 }
   0x8   : > { %p90_p3 = scmp.eq.s32.totalorder %s451_s14, 1  ;;  %p452_p5 = scmp.ge.s32.totalorder %s694_s12, 1 }
   0x9   : > { %p750_p4 = por %p929_p1, %p39_p0  ;;  %p97_p7 = scmp.lt.s32.totalorder %s694_s12, 3 }
   0xa   : > { %p755_p6 = por %p90_p3, %p39_p0  ;;  %s696_s18 = smov [#allocation5]  }
   0xb   : > { %s932_s15 = scalar_select %p750_p4, 1, 0 }
   0xc   : > { %s933_s16 = scalar_select %p755_p6, 1, 0 }
   0xd   : > { %p760_p8 = pnand %p452_p5, %p97_p7  ;;  %s109_s19 = sshll.u32 %s696_s18, 4  ;;  %s764_s19 = int_to_ptr.vmem [resolvable:$true] %s109_s19 }
   0xe   : > { %s776_s21 = sadd.s32 1, %s694_s12   ;;  %s26_s22 = sadd.s32 1, %s690_s11 }
   0xf   : > { %s934_s17 = scalar_select %p760_p8, 1, 0 }
  0x10   : > { %p505_p9 = pneg %p760_p8  ;;  %s23_s23 = ssub.s32 %s694_s12, %s776_s21 }
  0x11   : > { %s566_s26 = scalar_lea.hbm %s927_s1, 256 }
  0x12   : > { %p771_p11 = pnand %p505_p9, %p929_p1  ;;  %p567_p12 = scmp.ne.s32.totalorder %s927_s1, %s566_s26 }
  0x13   : > { %p573_p5 = scmp.lt.u32.totalorder %s566_s26, %s927_s1 }
  0x14   : > { %p568_p13 = pneg %p771_p11 }
  0x16   : > { %p569_p0 = pnand %p568_p13, %p567_p12 }
  0x18   : > { %p570_p3 = pneg %p569_p0 }
  0x1a   : > { %p575_p7 = pnand %p573_p5, %p570_p3 }
  0x1c   : > { %578 = shalt.err (!%p575_p7)
}
  0x1d   : > { %s579_s3 = scalar_lea.vmem %s764_s19, 256  ;;  %p587_p2 = scmp.lt.s32.totalorder %s764_s19, %s764_s19 }
  0x1e   : > { %p580_p9 = scmp.ne.s32.totalorder %s764_s19, %s579_s3  ;;  %p588_p6 = scmp.lt.s32.totalorder %s579_s3, %s579_s3 }
  0x20   : > { %p582_p10 = pnand %p580_p9, %p568_p13  ;;  %p589_p4 = por %p588_p6, %p587_p2 }
  0x22   : > { %p583_p1 = pneg %p582_p10 }
  0x24   : > { %p590_p8 = pnand %p589_p4, %p583_p1 }
  0x26   : > { %593 = shalt.err (!%p590_p8)
}
  0x27   : > { %s697_s4 = smov 64   ;;  %s698_s5 = smov 4  }
  0x28   : > { %508 = dma.hbm_to_vmem [thread:$0]  (!%p771_p11), %s927_s1, 256, %s764_s19, [#allocation6], %s697_s4, %s697_s4, %s698_s5  }
  0x29   : > { %p24_p2 = scmp.eq.s32.totalorder %s23_s23, 0  ;;  %p33_p1 = scmp.ne.s32.totalorder %s690_s11, %s686_s10 }
  0x2a   : > { %p34_p4 = scmp.eq.s32.totalorder %s694_s12, 0  ;;  %p518_p6 = scmp.lt.s32.totalorder %s694_s12, 2 }
  0x2b   : > { %s807_s8 = scalar_select %p24_p2, %s690_s11, %s26_s22  }
  0x2c   : > { %p35_p8 = por %p34_p4, %p33_p1  ;;  %p936_p10 = scmp.eq.s32.totalorder %s741_s13, 1 }
  0x2d   : > { %s123_s18 = sand.u32 1, %s690_s11   ;;  %s456_s24 = sshll.u32 %s694_s12, 7 }
  0x2e   : > { %p811_p12 = por %p936_p10, %p33_p1  ;;  %s455_s25 = sshll.u32 %s123_s18, 3 }
  0x2f   : > { %s820_s27 = scalar_lea.hbm %s926_s0, %s456_s24  ;;  %s127_s19 = scalar_lea.vmem [#allocation2], %s455_s25 }
  0x30   : > { %s134_s22 = sshll.u32 %s127_s19, 4  ;;  %p822_p11 = pnand %p518_p6, %p35_p8  ;;  %s826_s22 = int_to_ptr.vmem [resolvable:$true] %s134_s22 }
  0x31   : > { %s124_s28 = scalar_lea.sflag [#allocation3], %s123_s18  ;;  %s594_s29 = scalar_lea.hbm %s820_s27, 128 }
  0x32   : > { %p595_p13 = scmp.ne.s32.totalorder %s820_s27, %s594_s29  ;;  %p596_p0 = pneg %p822_p11 }
  0x33   : > { %s599_s4 = scalar_lea.hbm %s926_s0, 256  ;;  %p600_p7 = scmp.lt.u32.totalorder %s820_s27, %s926_s0 }
  0x34   : > { %p597_p3 = pnand %p596_p0, %p595_p13  ;;  %p601_p9 = scmp.lt.u32.totalorder %s599_s4, %s594_s29 }
  0x35   : > { %p603_p1 = scmp.lt.u32.totalorder %s594_s29, %s820_s27 }
  0x36   : > { %p598_p5 = pneg %p597_p3  ;;  %p602_p2 = por %p601_p9, %p600_p7 }
  0x38   : > { %p604_p4 = por %p603_p1, %p602_p2 }
  0x3a   : > { %p605_p6 = pnand %p604_p4, %p598_p5 }
  0x3c   : > { %608 = shalt.err (!%p605_p6)
}
  0x3d   : > { %s609_s7 = scalar_lea.vmem %s826_s22, 128  ;;  %s699_s18 = smov [#allocation2]  }
  0x3e   : > { %p610_p8 = scmp.ne.s32.totalorder %s826_s22, %s609_s7  ;;  %s614_s24 = sshll.u32 %s699_s18, 4  ;;  %s615_s24 = int_to_ptr.vmem [resolvable:$false] %s614_s24 }
  0x3f   : > { %s616_s25 = scalar_lea.vmem %s615_s24, 256  ;;  %p617_p3 = scmp.lt.s32.totalorder %s826_s22, %s615_s24 }
  0x40   : > { %p612_p10 = pnand %p610_p8, %p596_p0  ;;  %p618_p7 = scmp.lt.s32.totalorder %s616_s25, %s609_s7 }
  0x42   : > { %p613_p13 = pneg %p612_p10  ;;  %p619_p9 = por %p618_p7, %p617_p3 }
  0x44   : > { %p620_p2 = pnand %p619_p9, %p613_p13 }
  0x46   : > { %623 = shalt.err (!%p620_p2)
}
  0x47   : > { %512 = dma.hbm_to_vmem [thread:$0]  (!%p822_p11), %s820_s27, 128, %s826_s22, %s124_s28  }
  0x48   : > { %p939_p5 = scmp.ne.s32.totalorder %s934_s17, 0 }
  0x49   : > { %s856_s20 = sand.u32 (!%p939_p5), 1, %s686_s10   ;;  %p940_p0 = scmp.ne.s32.totalorder (!%p939_p5), %s932_s15, 0 }
  0x4a   : > { %143 = sbr.rel (%p939_p5) target bundleno = 1188 (0x4a4), region = 28  ;;  %s458_s26 = sshll.u32 (!%p939_p5), %s856_s20, 3 }
  0x4b   : > { %s146_s19 = scalar_lea.sflag (!%p939_p5), [#allocation3], %s856_s20  ;;  %s149_s29 = scalar_lea.vmem (!%p939_p5), [#allocation2], %s458_s26 }
  0x51   : > { %669 = dma.done.wait (%p940_p0), %s146_s19, 128  }
  0x52   : > { %671 = vsyncadd (%p940_p0), %s146_s19, 4294967168  ;;  %p941_p11 = scmp.eq.s32.totalorder %s741_s13, 0 }
  0x54   : > { %673 = dma.done.wait (%p941_p11), [#allocation6], 256   ;;  %p942_p1 = pmov %p941_p11 }
  0x55   : > { %v700_v0 = vmov 0.0   ;;  %vm701_vm0 = vmmov 0   ;;  %v560_v1 = vld [vmem:[#allocation5] sm:$0xff]   ;;  %v561_v2 = vld [vmem:[#allocation5 + $0x8] sm:$0xff]   ;;  %v175_v3 = vld [vmem:[%s149_s29] sm:$0xff]  ;;  %vm193_vm1 = vcmask 261120   ;;  %v288_v12 = vlaneseq }
  0x56   : > { %675 = vsyncadd (%p942_p1), [#allocation6], 4294967040  ;;  %477 = vmatprep.subr.bf16.mxu0 %v700_v0  ;;  %481 = vmatprep.mubr.msk.bf16.mxu0 %vm701_vm0, %v700_v0  ;;  %v176_v4 = vpack.c.bf16 %v175_v3, %v175_v3  ;;  %s702_s15 = smov 112   ;;  %vm241_vm2 = vcmask 130048   ;;  %vm294_vm4 = vcmask 64512   ;;  %s703_s17 = smov 96  }
  0x57   : > { %485 = vmatprep.subr.bf16.mxu1 %v700_v0  ;;  %487 = vmatprep.mubr.msk.bf16.mxu1 %vm701_vm0, %v700_v0  ;;  %v289_v13 = vshrl.u32 %v288_v12, 7  ;;  %v291_v14 = vand.u32 127, %v288_v12  ;;  %vm312_vm5 = vcmask 1043456   ;;  %s467_s27 = sshll.u32 %s741_s13, 7  ;;  %s173_s22 = scalar_lea.vmem [#allocation7], %s458_s26 }
  0x58   : > { %478 = vmatpush3.bf16.msra.mxu0 %v560_v1  ;;  %s371_s23 = sshll.u32 %s173_s22, 4  ;;  %s881_s3 = scalar_lea.hbm %s928_s2, %s467_s27  ;;  %s883_s23 = int_to_ptr.vmem [resolvable:$true] %s371_s23 }
  0x59   : > { %479 = vmatprep.subr.bf16.mxu0 %v700_v0  ;;  %vm292_vm3 = vcmp.le.s32.totalorder %v291_v14, %v289_v13  ;;  %s358_s4 = scalar_lea.sflag [#allocation4], %s856_s20  ;;  %s624_s13 = scalar_lea.vmem %s883_s23, 128 }
  0x5a   : > { %p625_p4 = scmp.ne.s32.totalorder %s883_s23, %s624_s13  ;;  %s704_s5 = smov [#allocation7]  }
  0x5b   : > { %s628_s6 = sshll.u32 %s704_s5, 4  ;;  %s629_s6 = int_to_ptr.vmem [resolvable:$false] %s628_s6 }
  0x5c   : > { %480 = vmatpush3.bf16.msra.mxu0 %v561_v2  ;;  %p626_p6 = pnand %p625_p4, %p811_p12  ;;  %s630_s7 = scalar_lea.vmem %s629_s6, 256 }
  0x5d   : > { %491 = vmatprep.subr.bf16.mxu0 %v700_v0  ;;  %p631_p10 = scmp.lt.s32.totalorder %s883_s23, %s629_s6  ;;  %p632_p13 = scmp.lt.s32.totalorder %s630_s7, %s624_s13 }
  0x5e   : > { %p627_p8 = pneg %p626_p6 }
  0x5f   : > { %482 = vmatmul.mubr.msk.bf16.vlgmr.msra.gmra.mrb[0].mxu0 %vm193_vm1, %v176_v4  ;;  %p633_p3 = por %p632_p13, %p631_p10 }
  0x60   : > { %493 = vmatprep.mubr.msk.bf16.mxu0 %vm701_vm0, %v700_v0 }
  0x61   : > { %p634_p7 = pnand %p633_p3, %p627_p8 }
 0x132   : > { %v231_v5 = vpop.f32.mrb[0].mxu0 }
 0x133   : > { %v237_v6 = vpack.c.bf16 %v231_v5, %v231_v5  ;;  %v483_v7 = vpop.f32.mrb[1].mxu0 }
 0x134   : > { %v234_v8 = vpop.f32.mrb[2].mxu0 }
 0x135   : > { %239 = vrot.lane.b32.xlu0 %v237_v6, %s702_s15  ;;  %v484_v9 = vpop.f32.mrb[3].mxu0 }
 0x1a7   : > { %v240_v10 = vpop.permute.xlu0 %239 }
 0x1a8   : > { %v246_v11 = vsel %vm241_vm2, %v240_v10, 0 }
 0x1a9   : > { %486 = vmatpush3.bf16.xpose.msra.mxu1 %v246_v11 }
 0x1b0   : > { %488 = vmatmul.mubr.msk.bf16.vlgmr.msra.gmra.mrb[0].mxu1 %vm241_vm2, %v237_v6 }
 0x283   : > { %v282_v15 = vpop.f32.mrb[0].mxu1 }
 0x284   : > { %v293_v16 = vsel %vm292_vm3, %v282_v15, -inf  ;;  %v489_v17 = vpop.f32.mrb[1].mxu1 }
 0x285   : > { %v285_v18 = vpop.f32.mrb[2].mxu1  ;;  %v295_v19 = vsel %vm294_vm4, %v293_v16, -inf }
 0x286   : > { %296 = vmax.xlane.f32.xlu0 %v295_v19  ;;  %v490_v20 = vpop.f32.mrb[3].mxu1 }
 0x313   : > { %v297_v21 = vpop.xlane.xlu0 %296 }
 0x314   : > { %v298_v22 = vsub.f32 %v293_v16, %v297_v21 }
 0x316   : > { %v299_v23 = vmul.f32 1.442695, %v298_v22 }
 0x318   : > { %562 = vpow2.f32 %v299_v23 }
 0x322   : > { %v563_v24 = vpop.eup %562 }
 0x323   : > { %v301_v25 = vsel %vm294_vm4, %v563_v24, 0.0 }
 0x324   : > { %302 = vadd.xlane.f32.xlu1 %v301_v25 }
 0x335   : > { %307 = vrot.lane.b32.xlu1 %v237_v6, %s703_s17 }
 0x3b1   : > { %v303_v26 = vpop.xlane.xlu1 %302 }
 0x3b2   : > { %564 = vrcp.f32 %v303_v26 }
 0x3b5   : > { %v308_v27 = vpop.permute.xlu1 %307 }
 0x3b6   : > { %v314_v28 = vsel %vm312_vm5, %v308_v27, 0 }
 0x3b7   : > { %492 = vmatpush3.bf16.msra.mxu0 %v314_v28 }
 0x3bc   : > { %v565_v29 = vpop.eup %564 }
 0x3bd   : > { %v305_v30 = vmul.f32 %v565_v29, %v563_v24 }
 0x3bf   : > { %v306_v31 = vpack.c.bf16 %v305_v30, %v305_v30 }
 0x3c1   : > { %494 = vmatmul.mubr.msk.bf16.vlgmr.msra.gmra.mrb[4].mxu0 %vm294_vm4, %v306_v31 }
 0x494   : > { %v350_v32 = vpop.f32.mrb[4].mxu0 }
 0x495   : > { %356 = vst.msk [vmem:[%s173_s22] sm:$0xff] %vm241_vm2, %v350_v32  ;;  %v495_v33 = vpop.f32.mrb[5].mxu0 }
 0x496   : > { %v353_v34 = vpop.f32.mrb[6].mxu0 }
 0x497   : > { %637 = shalt.err (!%p634_p7)
}
 0x498   : > { %s638_s18 = scalar_lea.hbm %s881_s3, 128  ;;  %s642_s20 = scalar_lea.hbm %s928_s2, 256 }
 0x499   : > { %p639_p9 = scmp.ne.s32.totalorder %s881_s3, %s638_s18  ;;  %p643_p0 = scmp.lt.u32.totalorder %s881_s3, %s928_s2 }
 0x49a   : > { %p644_p11 = scmp.lt.u32.totalorder %s642_s20, %s638_s18  ;;  %p646_p4 = scmp.lt.u32.totalorder %s638_s18, %s881_s3 }
 0x49b   : > { %p640_p2 = pnand %p639_p9, %p811_p12 }
 0x49c   : > { %p645_p1 = por %p644_p11, %p643_p0 }
 0x49d   : > { %p641_p5 = pneg %p640_p2 }
 0x49e   : > { %p647_p6 = por %p646_p4, %p645_p1 }
 0x4a0   : > { %p648_p8 = pnand %p647_p6, %p641_p5 }
 0x4a2   : > { %651 = shalt.err (!%p648_p8)
}
 0x4a3   : > { %503 = dma.vmem_to_hbm [thread:$0]  (%p811_p12), %s883_s23, 128, %s881_s3, %s358_s4   ;;  %v496_v35 = vpop.f32.mrb[7].mxu0 }
 0x4a4 PF: > { %s383_s29 = sand.u32 1, %s682_s9   ;;  %p943_p10 = scmp.ne.s32.totalorder %s933_s16, 0 }
 0x4a5   : > { %p944_p13 = scmp.ge.s32.totalorder %s694_s12, 2  ;;  %s384_s15 = scalar_lea.sflag [#allocation4], %s383_s29 }
 0x4a7   : > { %p514_p3 = pnand %p944_p13, %p943_p10 }
 0x4a9   : > { %677 = dma.done.wait (!%p514_p3), %s384_s15, 128  }
 0x4aa   : > { %679 = vsyncadd (!%p514_p3), %s384_s15, 4294967168  ;;  %p16_p7 = scmp.ge.s32.totalorder %s776_s21, 4   ;;  %s945_s9 = smov %s686_s10 }
 0x4ab   : > { %s946_s10 = smov %s690_s11  ;;  %s947_s11 = smov %s807_s8 }
 0x4ac   : > { %s948_s12 = smov %s776_s21  ;;  %18 = sbr.rel (!%p16_p7) target bundleno = 6 (0x6), region = 77 }
 0x4b3   :  { %389 = vsyncpa [#allocation3], 1 }
 0x4b4   :  { %391 = vsyncpa [#allocation3 + $0x1], 1 }
 0x4b5   :  { %392 = vsyncpa [#allocation6], 1 }
 0x4b6   :  { %393 = vsyncpa [#allocation4], 1 }
 0x4b7   :  { %395 = vsyncpa [#allocation4 + $0x1], 1 }

</bundles_post_ra>
